<compile_context>
chip_gen: v7x
topology: tpu7x:2x2x1
jax: 0.10.0
libtpu: 0.0.40
codegen_flags: <defaults>
</compile_context>

<pallas_src>
import functools
import math

import jax
import jax.numpy as jnp
from jax.experimental import pallas as pl
from jax.experimental.pallas import tpu as pltpu


# ----------------------------------------------------------------------------
# Pallas kernel: one fused conv layer
#   y = act(W @ X_cols + b)           (optionally followed by 2x2 max-pool)
#   W      : (Co, K*K*Ci)             bf16  (host-prepped)
#   X_cols : (K*K*Ci, M)              bf16  im2col^T slab, lanes = output pos.
#   b      : (Co, 1)                  f32
#   out    : (Co, M) or (Co, M // 4)  f32   channels in sublanes, pos. in lanes
# ----------------------------------------------------------------------------
def _conv_act_kernel(x_ref, w_ref, b_ref, o_ref, *, activation, pooled):
    # Single MXU matmul: K*K taps folded into the contraction dim
    # (9 / 144 / 288 / 576 / 128 instead of Ci <= 16).
    y = jnp.dot(w_ref[...], x_ref[...], preferred_element_type=jnp.float32)
    y = y + b_ref[...]                        # (Co, 1) lane-broadcast bias
    if activation == "relu":
        y = jnp.maximum(y, 0.0)
    else:                                     # "tanh" (EUP)
        y = jnp.tanh(y)
    if pooled:
        # Columns are 4 pool-phase blocks of q lanes each; q is a multiple of
        # 128 by construction, so the 2x2 max-pool is three jnp.maximum over
        # 128-aligned lane slices.
        q = y.shape[1] // 4
        y = jnp.maximum(jnp.maximum(y[:, 0 * q:1 * q], y[:, 1 * q:2 * q]),
                        jnp.maximum(y[:, 2 * q:3 * q], y[:, 3 * q:4 * q]))
    o_ref[...] = y.astype(o_ref.dtype)


def _vmem_spec():
    return pl.BlockSpec(memory_space=pltpu.MemorySpace.VMEM)


def _fused_conv_call(slab_t, w2d, b, activation, pooled):
    kkci, m = slab_t.shape
    co = w2d.shape[0]
    out_m = m // 4 if pooled else m
    kern = functools.partial(_conv_act_kernel, activation=activation, pooled=pooled)
    return pl.pallas_call(
        kern,
        out_shape=jax.ShapeDtypeStruct((co, out_m), jnp.float32),
        in_specs=[_vmem_spec(), _vmem_spec(), _vmem_spec()],
        out_specs=_vmem_spec(),
    )(slab_t.astype(jnp.bfloat16),
      w2d.astype(jnp.bfloat16),
      b.reshape(co, 1).astype(jnp.float32))


# ----------------------------------------------------------------------------
# Host-side glue (XLA): im2col^T slabs and weight reshaping.
# TODO(synk): fusing all 5 layers into one pallas_call needs in-kernel im2col
# (sublane-regrouping reshapes Mosaic does not support); gathers stay in XLA.
# ----------------------------------------------------------------------------
def _conv_w2d(w_oikk):
    """PyTorch Conv2d weight (Co, Ci, K, K) -> (Co, K*K*Ci), cols = (kh, kw, ci)."""
    co, ci, k, _ = w_oikk.shape
    return jnp.transpose(w_oikk, (0, 2, 3, 1)).reshape(co, k * k * ci)


def _conv_slab_t(x, k):
    """x: (N,H,W,Ci) -> im2col^T (K*K*Ci, N*OH*OW); rows=(kh,kw,ci), cols=(n,oh,ow)."""
    n, h, w, ci = x.shape
    oh, ow = h - k + 1, w - k + 1
    taps = []
    for kh in range(k):
        for kw in range(k):
            taps.append(x[:, kh:kh + oh, kw:kw + ow, :].reshape(n * oh * ow, ci))
    return jnp.concatenate(taps, axis=1).T, (n, oh, ow)


def _conv_pool_slab_t(x, k, lane_pad=128):
    """im2col^T for conv + 2x2 maxpool: columns are 4 pool-phase blocks (dh,dw),
    each zero-padded to `lane_pad` lanes, within-block order (n, ph, pw)."""
    n, h, w, ci = x.shape
    oh, ow = h - k + 1, w - k + 1
    ph, pw = oh // 2, ow // 2                 # floor, like PyTorch MaxPool2d(2,2)
    q = n * ph * pw
    assert q <= lane_pad, (q, lane_pad)
    blocks = []
    for dh in (0, 1):
        for dw in (0, 1):
            taps = []
            for kh in range(k):
                for kw in range(k):
                    hs, ws = dh + kh, dw + kw
                    tap = x[:, hs:hs + 2 * ph - 1:2, ws:ws + 2 * pw - 1:2, :]
                    taps.append(tap.reshape(q, ci))
            blk = jnp.concatenate(taps, axis=1)            # (q, K*K*Ci)
            blocks.append(jnp.pad(blk, ((0, lane_pad - q), (0, 0))))
    return jnp.concatenate(blocks, axis=0).T, (n, ph, pw, q)


# ----------------------------------------------------------------------------
# Layer wrappers (one pallas_call each)
# ----------------------------------------------------------------------------
def _conv_relu_pool(x, w_oikk, b):
    """Conv2d(stride=1, pad=0) + ReLU + MaxPool2d(2,2), fused in one kernel."""
    slab_t, (n, ph, pw, q) = _conv_pool_slab_t(x, w_oikk.shape[2])
    y = _fused_conv_call(slab_t, _conv_w2d(w_oikk), b, "relu", pooled=True)
    return y[:, :q].T.reshape(n, ph, pw, -1)


def _tconv_act(x, w_iokk, b, activation):
    """ConvTranspose2d(stride=1, pad=0) + activation, one kernel.

    stride=1/pad=0 transposed conv == full conv on a zero-padded input with the
    kernel flipped spatially and in/out channels swapped."""
    ci, co, k, _ = w_iokk.shape
    w_conv = jnp.transpose(jnp.flip(w_iokk, axis=(2, 3)), (1, 0, 2, 3))   # (Co,Ci,K,K)
    xp = jnp.pad(x, ((0, 0), (k - 1, k - 1), (k - 1, k - 1), (0, 0)))
    slab_t, (n, oh, ow) = _conv_slab_t(xp, k)
    y = _fused_conv_call(slab_t, _conv_w2d(w_conv), b, activation, pooled=False)
    return y.T.reshape(n, oh, ow, co)


# ----------------------------------------------------------------------------
# Autoencoder forward (mirrors the PyTorch module)
# ----------------------------------------------------------------------------
def autoencoder_forward(x_nchw, params):
    x = jnp.transpose(x_nchw, (0, 2, 3, 1)).astype(jnp.float32)        # NCHW->NHWC
    # encoder: conv + relu + pool fused per layer
    x = _conv_relu_pool(x, params["conv1_w"], params["conv1_b"])       # (N, 7, 7,16)
    x = _conv_relu_pool(x, params["conv2_w"], params["conv2_b"])       # (N, 2, 2, 8)
    # decoder
    x = _tconv_act(x, params["iconv1_w"], params["iconv1_b"], "relu")  # (N, 7, 7,16)
    x = _tconv_act(x, params["iconv2_w"], params["iconv2_b"], "relu")  # (N,12,12, 8)
    x = _tconv_act(x, params["iconv3_w"], params["iconv3_b"], "tanh")  # (N,15,15, 1)
    return jnp.transpose(x, (0, 3, 1, 2))                              # NHWC->NCHW


def init_params(key):
    """Deterministic PyTorch-style uniform(-1/sqrt(fan_in), +1/sqrt(fan_in))."""
    ks = jax.random.split(key, 10)

    def u(k, shape, fan_in):
        bound = 1.0 / math.sqrt(fan_in)
        return jax.random.uniform(k, shape, jnp.float32, -bound, bound)

    return {
        # Conv2d weights: (Cout, Cin, K, K)
        "conv1_w": u(ks[0], (16, 1, 3, 3), 1 * 9),
        "conv1_b": u(ks[1], (16,), 1 * 9),
        "conv2_w": u(ks[2], (8, 16, 3, 3), 16 * 9),
        "conv2_b": u(ks[3], (8,), 16 * 9),
        # ConvTranspose2d weights: (Cin, Cout, K, K)
        "iconv1_w": u(ks[4], (8, 16, 6, 6), 8 * 36),
        "iconv1_b": u(ks[5], (16,), 8 * 36),
        "iconv2_w": u(ks[6], (16, 8, 6, 6), 16 * 36),
        "iconv2_b": u(ks[7], (8,), 16 * 36),
        "iconv3_w": u(ks[8], (8, 1, 4, 4), 8 * 16),
        "iconv3_b": u(ks[9], (1,), 8 * 16),
    }


if __name__ == "__main__":
    key = jax.random.PRNGKey(0)
    pkey, xkey = jax.random.split(key)
    params = init_params(pkey)

    # Input consistent with nn.Conv2d(1, 16, 3): NCHW, 1 channel, 16x16.
    x = jax.random.normal(xkey, (2, 1, 16, 16), jnp.float32)

    fwd = jax.jit(autoencoder_forward)
    y = fwd(x, params)
    jax.block_until_ready(y)

    # 16 -> conv3 ->14 -> pool ->7 -> conv3 ->5 -> pool ->2
    #    -> tconv6 ->7 -> tconv6 ->12 -> tconv4 ->15
    assert y.shape == (2, 1, 15, 15), y.shape
    assert bool(jnp.all(jnp.isfinite(y)))
    print("KERNEL_OK")
</pallas_src>

<mosaic_0001>
module attributes {stable_mosaic.version = 11 : i64} {
  func.func @_conv_act_kernel(%arg0: memref<9x512xbf16, #tpu.memory_space<vmem>>, %arg1: memref<16x9xbf16, #tpu.memory_space<vmem>>, %arg2: memref<16x1xf32, #tpu.memory_space<vmem>>, %arg3: memref<16x128xf32, #tpu.memory_space<vmem>>) attributes {dimension_semantics = [], scalar_prefetch = 0 : i64, scratch_operands = 0 : i64, tpu.core_type = #tpu.core_type<tc>} {
    %c0 = arith.constant 0 : index
    %c0_0 = arith.constant 0 : index
    %0 = vector.load %arg1[%c0, %c0_0] : memref<16x9xbf16, #tpu.memory_space<vmem>>, vector<16x9xbf16>
    %c0_1 = arith.constant 0 : index
    %c0_2 = arith.constant 0 : index
    %1 = vector.load %arg0[%c0_1, %c0_2] : memref<9x512xbf16, #tpu.memory_space<vmem>>, vector<9x512xbf16>
    %cst = arith.constant dense<0.000000e+00> : vector<16x512xf32>
    %2 = tpu.matmul %0, %1, %cst {dimension_numbers = #tpu.dot_dimension_numbers<[1], [0], [0], [1], [0, 0, 1, 1], [], []>} : vector<16x9xbf16>, vector<9x512xbf16>, vector<16x512xf32> -> vector<16x512xf32>
    %c0_3 = arith.constant 0 : index
    %c0_4 = arith.constant 0 : index
    %3 = vector.load %arg2[%c0_3, %c0_4] : memref<16x1xf32, #tpu.memory_space<vmem>>, vector<16x1xf32>
    %4 = vector.broadcast %3 : vector<16x1xf32> to vector<16x512xf32>
    %5 = arith.addf %2, %4 : vector<16x512xf32>
    %cst_5 = arith.constant 0.000000e+00 : f32
    %6 = vector.broadcast %cst_5 : f32 to vector<16x512xf32>
    %7 = arith.maximumf %5, %6 : vector<16x512xf32>
    %8 = vector.extract_strided_slice %7 {offsets = [0, 0], sizes = [16, 128], strides = [1, 1]} : vector<16x512xf32> to vector<16x128xf32>
    %9 = vector.extract_strided_slice %7 {offsets = [0, 128], sizes = [16, 128], strides = [1, 1]} : vector<16x512xf32> to vector<16x128xf32>
    %10 = arith.maximumf %8, %9 : vector<16x128xf32>
    %11 = vector.extract_strided_slice %7 {offsets = [0, 256], sizes = [16, 128], strides = [1, 1]} : vector<16x512xf32> to vector<16x128xf32>
    %12 = vector.extract_strided_slice %7 {offsets = [0, 384], sizes = [16, 128], strides = [1, 1]} : vector<16x512xf32> to vector<16x128xf32>
    %13 = arith.maximumf %11, %12 : vector<16x128xf32>
    %14 = arith.maximumf %10, %13 : vector<16x128xf32>
    %c0_6 = arith.constant 0 : index
    %c0_7 = arith.constant 0 : index
    %15 = vector.load %arg3[%c0_6, %c0_7] : memref<16x128xf32, #tpu.memory_space<vmem>>, vector<16x128xf32>
    tpu.vector_store %arg3[%c0_6, %c0_7], %14 {strides = array<i32>} : memref<16x128xf32, #tpu.memory_space<vmem>>, vector<16x128xf32>,
    return
  }
}

module attributes {stable_mosaic.version = 11 : i64} {
  func.func @_conv_act_kernel(%arg0: memref<144x512xbf16, #tpu.memory_space<vmem>>, %arg1: memref<8x144xbf16, #tpu.memory_space<vmem>>, %arg2: memref<8x1xf32, #tpu.memory_space<vmem>>, %arg3: memref<8x128xf32, #tpu.memory_space<vmem>>) attributes {dimension_semantics = [], scalar_prefetch = 0 : i64, scratch_operands = 0 : i64, tpu.core_type = #tpu.core_type<tc>} {
    %c0 = arith.constant 0 : index
    %c0_0 = arith.constant 0 : index
    %0 = vector.load %arg1[%c0, %c0_0] : memref<8x144xbf16, #tpu.memory_space<vmem>>, vector<8x144xbf16>
    %c0_1 = arith.constant 0 : index
    %c0_2 = arith.constant 0 : index
    %1 = vector.load %arg0[%c0_1, %c0_2] : memref<144x512xbf16, #tpu.memory_space<vmem>>, vector<144x512xbf16>
    %cst = arith.constant dense<0.000000e+00> : vector<8x512xf32>
    %2 = tpu.matmul %0, %1, %cst {dimension_numbers = #tpu.dot_dimension_numbers<[1], [0], [0], [1], [0, 0, 1, 1], [], []>} : vector<8x144xbf16>, vector<144x512xbf16>, vector<8x512xf32> -> vector<8x512xf32>
    %c0_3 = arith.constant 0 : index
    %c0_4 = arith.constant 0 : index
    %3 = vector.load %arg2[%c0_3, %c0_4] : memref<8x1xf32, #tpu.memory_space<vmem>>, vector<8x1xf32>
    %4 = vector.broadcast %3 : vector<8x1xf32> to vector<8x512xf32>
    %5 = arith.addf %2, %4 : vector<8x512xf32>
    %cst_5 = arith.constant 0.000000e+00 : f32
    %6 = vector.broadcast %cst_5 : f32 to vector<8x512xf32>
    %7 = arith.maximumf %5, %6 : vector<8x512xf32>
    %8 = vector.extract_strided_slice %7 {offsets = [0, 0], sizes = [8, 128], strides = [1, 1]} : vector<8x512xf32> to vector<8x128xf32>
    %9 = vector.extract_strided_slice %7 {offsets = [0, 128], sizes = [8, 128], strides = [1, 1]} : vector<8x512xf32> to vector<8x128xf32>
    %10 = arith.maximumf %8, %9 : vector<8x128xf32>
    %11 = vector.extract_strided_slice %7 {offsets = [0, 256], sizes = [8, 128], strides = [1, 1]} : vector<8x512xf32> to vector<8x128xf32>
    %12 = vector.extract_strided_slice %7 {offsets = [0, 384], sizes = [8, 128], strides = [1, 1]} : vector<8x512xf32> to vector<8x128xf32>
    %13 = arith.maximumf %11, %12 : vector<8x128xf32>
    %14 = arith.maximumf %10, %13 : vector<8x128xf32>
    %c0_6 = arith.constant 0 : index
    %c0_7 = arith.constant 0 : index
    %15 = vector.load %arg3[%c0_6, %c0_7] : memref<8x128xf32, #tpu.memory_space<vmem>>, vector<8x128xf32>
    tpu.vector_store %arg3[%c0_6, %c0_7], %14 {strides = array<i32>} : memref<8x128xf32, #tpu.memory_space<vmem>>, vector<8x128xf32>,
    return
  }
}

module attributes {stable_mosaic.version = 11 : i64} {
  func.func @_conv_act_kernel(%arg0: memref<288x98xbf16, #tpu.memory_space<vmem>>, %arg1: memref<16x288xbf16, #tpu.memory_space<vmem>>, %arg2: memref<16x1xf32, #tpu.memory_space<vmem>>, %arg3: memref<16x98xf32, #tpu.memory_space<vmem>>) attributes {dimension_semantics = [], scalar_prefetch = 0 : i64, scratch_operands = 0 : i64, tpu.core_type = #tpu.core_type<tc>} {
    %c0 = arith.constant 0 : index
    %c0_0 = arith.constant 0 : index
    %0 = vector.load %arg1[%c0, %c0_0] : memref<16x288xbf16, #tpu.memory_space<vmem>>, vector<16x288xbf16>
    %c0_1 = arith.constant 0 : index
    %c0_2 = arith.constant 0 : index
    %1 = vector.load %arg0[%c0_1, %c0_2] : memref<288x98xbf16, #tpu.memory_space<vmem>>, vector<288x98xbf16>
    %cst = arith.constant dense<0.000000e+00> : vector<16x98xf32>
    %2 = tpu.matmul %0, %1, %cst {dimension_numbers = #tpu.dot_dimension_numbers<[1], [0], [0], [1], [0, 0, 1, 1], [], []>} : vector<16x288xbf16>, vector<288x98xbf16>, vector<16x98xf32> -> vector<16x98xf32>
    %c0_3 = arith.constant 0 : index
    %c0_4 = arith.constant 0 : index
    %3 = vector.load %arg2[%c0_3, %c0_4] : memref<16x1xf32, #tpu.memory_space<vmem>>, vector<16x1xf32>
    %4 = vector.broadcast %3 : vector<16x1xf32> to vector<16x98xf32>
    %5 = arith.addf %2, %4 : vector<16x98xf32>
    %cst_5 = arith.constant 0.000000e+00 : f32
    %6 = vector.broadcast %cst_5 : f32 to vector<16x98xf32>
    %7 = arith.maximumf %5, %6 : vector<16x98xf32>
    %c0_6 = arith.constant 0 : index
    %c0_7 = arith.constant 0 : index
    %8 = vector.load %arg3[%c0_6, %c0_7] : memref<16x98xf32, #tpu.memory_space<vmem>>, vector<16x98xf32>
    tpu.vector_store %arg3[%c0_6, %c0_7], %7 {strides = array<i32>} : memref<16x98xf32, #tpu.memory_space<vmem>>, vector<16x98xf32>,
    return
  }
}

module attributes {stable_mosaic.version = 11 : i64} {
  func.func @_conv_act_kernel(%arg0: memref<576x288xbf16, #tpu.memory_space<vmem>>, %arg1: memref<8x576xbf16, #tpu.memory_space<vmem>>, %arg2: memref<8x1xf32, #tpu.memory_space<vmem>>, %arg3: memref<8x288xf32, #tpu.memory_space<vmem>>) attributes {dimension_semantics = [], scalar_prefetch = 0 : i64, scratch_operands = 0 : i64, tpu.core_type = #tpu.core_type<tc>} {
    %c0 = arith.constant 0 : index
    %c0_0 = arith.constant 0 : index
    %0 = vector.load %arg1[%c0, %c0_0] : memref<8x576xbf16, #tpu.memory_space<vmem>>, vector<8x576xbf16>
    %c0_1 = arith.constant 0 : index
    %c0_2 = arith.constant 0 : index
    %1 = vector.load %arg0[%c0_1, %c0_2] : memref<576x288xbf16, #tpu.memory_space<vmem>>, vector<576x288xbf16>
    %cst = arith.constant dense<0.000000e+00> : vector<8x288xf32>
    %2 = tpu.matmul %0, %1, %cst {dimension_numbers = #tpu.dot_dimension_numbers<[1], [0], [0], [1], [0, 0, 1, 1], [], []>} : vector<8x576xbf16>, vector<576x288xbf16>, vector<8x288xf32> -> vector<8x288xf32>
    %c0_3 = arith.constant 0 : index
    %c0_4 = arith.constant 0 : index
    %3 = vector.load %arg2[%c0_3, %c0_4] : memref<8x1xf32, #tpu.memory_space<vmem>>, vector<8x1xf32>
    %4 = vector.broadcast %3 : vector<8x1xf32> to vector<8x288xf32>
    %5 = arith.addf %2, %4 : vector<8x288xf32>
    %cst_5 = arith.constant 0.000000e+00 : f32
    %6 = vector.broadcast %cst_5 : f32 to vector<8x288xf32>
    %7 = arith.maximumf %5, %6 : vector<8x288xf32>
    %c0_6 = arith.constant 0 : index
    %c0_7 = arith.constant 0 : index
    %8 = vector.load %arg3[%c0_6, %c0_7] : memref<8x288xf32, #tpu.memory_space<vmem>>, vector<8x288xf32>
    tpu.vector_store %arg3[%c0_6, %c0_7], %7 {strides = array<i32>} : memref<8x288xf32, #tpu.memory_space<vmem>>, vector<8x288xf32>,
    return
  }
}

module attributes {stable_mosaic.version = 11 : i64} {
  func.func @_conv_act_kernel(%arg0: memref<128x450xbf16, #tpu.memory_space<vmem>>, %arg1: memref<1x128xbf16, #tpu.memory_space<vmem>>, %arg2: memref<1x1xf32, #tpu.memory_space<vmem>>, %arg3: memref<1x450xf32, #tpu.memory_space<vmem>>) attributes {dimension_semantics = [], scalar_prefetch = 0 : i64, scratch_operands = 0 : i64, tpu.core_type = #tpu.core_type<tc>} {
    %c0 = arith.constant 0 : index
    %c0_0 = arith.constant 0 : index
    %0 = vector.load %arg1[%c0, %c0_0] : memref<1x128xbf16, #tpu.memory_space<vmem>>, vector<1x128xbf16>
    %c0_1 = arith.constant 0 : index
    %c0_2 = arith.constant 0 : index
    %1 = vector.load %arg0[%c0_1, %c0_2] : memref<128x450xbf16, #tpu.memory_space<vmem>>, vector<128x450xbf16>
    %cst = arith.constant dense<0.000000e+00> : vector<1x450xf32>
    %2 = tpu.matmul %0, %1, %cst {dimension_numbers = #tpu.dot_dimension_numbers<[1], [0], [0], [1], [0, 0, 1, 1], [], []>} : vector<1x128xbf16>, vector<128x450xbf16>, vector<1x450xf32> -> vector<1x450xf32>
    %c0_3 = arith.constant 0 : index
    %c0_4 = arith.constant 0 : index
    %3 = vector.load %arg2[%c0_3, %c0_4] : memref<1x1xf32, #tpu.memory_space<vmem>>, vector<1x1xf32>
    %4 = vector.broadcast %3 : vector<1x1xf32> to vector<1x450xf32>
    %5 = arith.addf %2, %4 : vector<1x450xf32>
    %6 = math.tanh %5 : vector<1x450xf32>
    %c0_5 = arith.constant 0 : index
    %c0_6 = arith.constant 0 : index
    %7 = vector.load %arg3[%c0_5, %c0_6] : memref<1x450xf32, #tpu.memory_space<vmem>>, vector<1x450xf32>
    tpu.vector_store %arg3[%c0_5, %c0_6], %6 {strides = array<i32>} : memref<1x450xf32, #tpu.memory_space<vmem>>, vector<1x450xf32>,
    return
  }
}

</mosaic_0001>

<bundles_post_ra>
// kernel: autoencoder_forward.5
= control target key start
LH: loop header
LB: loop body
LE: loop exit
PB: predicated region body
PF: predicated region fallthrough
CT: control target
= control target key end

     0   :  { %vm58_vm0 = vcmask 1043456   ;;  %vm59_vm1 = vcmask 1044480   ;;  %v197_v1 = vmov 0   ;;  %v198_v2 = vmov 65535   ;;  %s246_s0 = inlined_call_operand.vmem [shape: bf16[9,512], index: 0, kind: input, shape index: {}]   ;;  %s247_s1 = inlined_call_operand.vmem [shape: bf16[16,9], index: 1, kind: input, shape index: {}]   ;;  %s248_s2 = inlined_call_operand.vmem [shape: f32[16,1], index: 2, kind: input, shape index: {}]   ;;  %s249_s3 = inlined_call_operand.vmem [shape: f32[16,128], index: 3, kind: output, shape index: {}]  }
   0x1   :  { %v190_v0 = vld [vmem:[%s246_s0 + $0x4] ss:$16 sps:$4 sm:$0x1f]   ;;  %106 = vmatprep.mubr.bf16.mxu0 %v197_v1  ;;  %149 = vmatprep.mubr.bf16.mxu1 %v197_v1  ;;  %v60_v3 = vsel %vm58_vm0, 4294967295, %v198_v2  ;;  %v22_v14 = vld [vmem:[%s248_s2 + $0x8] sm:$0xff]  ;;  %vm54_vm2 = vcmask 72704  }
   0x2   :  { %189 = vset.pattern.permute.xlu0 %v197_v1  ;;  %v61_v4 = vsel %vm59_vm1, %v60_v3, 0  ;;  %v192_v5 = vld [vmem:[%s246_s0 + $0xc] ss:$16 sps:$4 sm:$0x1f]   ;;  %v21_v10 = vld [vmem:[%s248_s2] sm:$0xff] }
   0x3   :  { %v66_v6 = vand.u32 %v190_v0, %v61_v4  ;;  %v194_v7 = vld [vmem:[%s246_s0] ss:$16 sps:$4 sm:$0x1f]   ;;  %v195_v8 = vld [vmem:[%s246_s0 + $0x8] ss:$16 sps:$4 sm:$0x1f]   ;;  %v72_v9 = vand.u32 %v192_v5, %v61_v4  ;;  %25 = vperm.xlu0 %189, %v21_v10  }
   0x4   :  { %v63_v11 = vand.u32 %v194_v7, %v61_v4  ;;  %v69_v12 = vand.u32 %v195_v8, %v61_v4  ;;  %v196_v13 = vld [vmem:[%s247_s1] sm:$0xff]  }
   0x5   :  { %74 = vmatprep.subr.bf16.mxu0 %v66_v6  ;;  %117 = vmatprep.subr.bf16.mxu1 %v72_v9 }
   0x6   :  { %75 = vmatpush1.bf16.msra.mxu0 %v63_v11  ;;  %118 = vmatpush1.bf16.msra.mxu1 %v69_v12 }
   0x7   :  { %30 = vperm.xlu0 %189, %v22_v14  }
   0x9   :  { %185 = vmatmul.mubr.msk.bf16.vlgmr.msra.gmra.mrb[0].mxu0 %vm54_vm2, %v196_v13  ;;  %186 = vmatmul.mubr.msk.bf16.vlgmr.msra.gmra.mrb[0].mxu1 %vm54_vm2, %v196_v13 }
  0x82   :  { %v26_v15 = vpop.permute.xlu0 %25 }
  0x86   :  { %v31_v16 = vpop.permute.xlu0 %30 }
  0xdc   :  { %v108_v17 = vpop.f32.mrb[0].mxu0  ;;  %v151_v18 = vpop.f32.mrb[0].mxu1 }
  0xdd   :  { %v109_v19 = vadd.f32 %v108_v17, %v26_v15  ;;  %v152_v20 = vadd.f32 %v151_v18, %v26_v15  ;;  %v110_v21 = vpop.f32.mrb[1].mxu0  ;;  %v153_v22 = vpop.f32.mrb[1].mxu1 }
  0xde   :  { %v111_v23 = vadd.f32 %v110_v21, %v26_v15  ;;  %v154_v24 = vadd.f32 %v153_v22, %v26_v15  ;;  %v112_v25 = vpop.f32.mrb[2].mxu0  ;;  %v155_v26 = vpop.f32.mrb[2].mxu1 }
  0xdf   :  { %v160_v27 = vmax.f32 %v109_v19, 0.0  ;;  %v162_v28 = vmax.f32 %v152_v20, 0.0  ;;  %v113_v29 = vadd.f32 %v112_v25, %v31_v16  ;;  %v156_v30 = vadd.f32 %v155_v26, %v31_v16  ;;  %v114_v31 = vpop.f32.mrb[3].mxu0  ;;  %v157_v32 = vpop.f32.mrb[3].mxu1 }
  0xe0   :  { %v161_v33 = vmax.f32 %v111_v23, 0.0  ;;  %v163_v34 = vmax.f32 %v154_v24, 0.0  ;;  %v115_v35 = vadd.f32 %v114_v31, %v31_v16  ;;  %v158_v36 = vadd.f32 %v157_v32, %v31_v16 }
  0xe1   :  { %v164_v37 = vmax.f32 %v113_v29, 0.0  ;;  %v166_v38 = vmax.f32 %v156_v30, 0.0 }
  0xe2   :  { %v168_v39 = vmax.f32 %v160_v27, %v161_v33  ;;  %v170_v40 = vmax.f32 %v162_v28, %v163_v34  ;;  %v165_v41 = vmax.f32 %v115_v35, 0.0  ;;  %v167_v42 = vmax.f32 %v158_v36, 0.0 }
  0xe4   :  { %v172_v43 = vmax.f32 %v168_v39, %v170_v40  ;;  %v169_v44 = vmax.f32 %v164_v37, %v165_v41  ;;  %v171_v45 = vmax.f32 %v166_v38, %v167_v42 }
  0xe6   :  { %174 = vst [vmem:[%s249_s3] sm:$0xff] %v172_v43  ;;  %v173_v46 = vmax.f32 %v169_v44, %v171_v45 }
  0xe8   :  { %175 = vst [vmem:[%s249_s3 + $0x8] sm:$0xff] %v173_v46 }

// kernel: autoencoder_forward.6
= control target key start
LH: loop header
LB: loop body
LE: loop exit
PB: predicated region body
PF: predicated region fallthrough
CT: control target
= control target key end

     0   :  { %v440_v1 = vmov 0   ;;  %vm244_vm0 = vcmask 130048   ;;  %s578_s0 = inlined_call_operand.vmem [shape: bf16[144,512], index: 0, kind: input, shape index: {}]   ;;  %s579_s1 = inlined_call_operand.vmem [shape: bf16[8,144], index: 1, kind: input, shape index: {}]   ;;  %s580_s2 = inlined_call_operand.vmem [shape: f32[8,1], index: 2, kind: input, shape index: {}]   ;;  %s581_s3 = inlined_call_operand.vmem [shape: f32[8,128], index: 3, kind: output, shape index: {}]  }
   0x1   :  { %v384_v0 = vld [vmem:[%s578_s0 + $0x4] ss:$16 sps:$4 sm:$0xff]   ;;  %383 = vset.pattern.permute.xlu0 %v440_v1  ;;  %v386_v2 = vld [vmem:[%s578_s0 + $0xc] ss:$16 sps:$4 sm:$0xff]   ;;  %v388_v3 = vld [vmem:[%s578_s0] ss:$16 sps:$4 sm:$0xff]  }
   0x2   :  { %248 = vmatprep.subr.bf16.mxu0 %v384_v0  ;;  %v389_v4 = vld [vmem:[%s578_s0 + $0x8] ss:$16 sps:$4 sm:$0xff]   ;;  %289 = vmatprep.subr.bf16.mxu1 %v386_v2  ;;  %v390_v5 = vld [vmem:[%s578_s0 + $0x24] ss:$16 sps:$4 sm:$0xff]   ;;  %v392_v6 = vld [vmem:[%s578_s0 + $0x2c] ss:$16 sps:$4 sm:$0xff]  }
   0x3   :  { %249 = vmatpush1.bf16.msra.mxu0 %v388_v3  ;;  %290 = vmatpush1.bf16.msra.mxu1 %v389_v4  ;;  %v394_v7 = vld [vmem:[%s578_s0 + $0x20] ss:$16 sps:$4 sm:$0xff]   ;;  %v395_v8 = vld [vmem:[%s578_s0 + $0x28] ss:$16 sps:$4 sm:$0xff]   ;;  %v396_v9 = vld [vmem:[%s578_s0 + $0x44] ss:$16 sps:$4 sm:$0xff]  }
   0x4   :  { %250 = vmatprep.subr.bf16.mxu0 %v390_v5  ;;  %291 = vmatprep.subr.bf16.mxu1 %v392_v6  ;;  %v398_v10 = vld [vmem:[%s578_s0 + $0x4c] ss:$16 sps:$4 sm:$0xff]   ;;  %v400_v11 = vld [vmem:[%s578_s0 + $0x40] ss:$16 sps:$4 sm:$0xff]   ;;  %v401_v12 = vld [vmem:[%s578_s0 + $0x48] ss:$16 sps:$4 sm:$0xff]  }
   0x5   :  { %v402_v13 = vld [vmem:[%s578_s0 + $0x64] ss:$16 sps:$4 sm:$0xff]   ;;  %v404_v14 = vld [vmem:[%s578_s0 + $0x6c] ss:$16 sps:$4 sm:$0xff]   ;;  %v406_v15 = vld [vmem:[%s578_s0 + $0x60] ss:$16 sps:$4 sm:$0xff]  }
   0x6   :  { %v407_v16 = vld [vmem:[%s578_s0 + $0x68] ss:$16 sps:$4 sm:$0xff]   ;;  %v408_v17 = vld [vmem:[%s578_s0 + $0x84] ss:$16 sps:$4 sm:$0xff]   ;;  %v410_v18 = vld [vmem:[%s578_s0 + $0x8c] ss:$16 sps:$4 sm:$0xff]  }
   0x7   :  { %251 = vmatpush1.bf16.msra.mxu0 %v394_v7  ;;  %292 = vmatpush1.bf16.msra.mxu1 %v395_v8  ;;  %v412_v19 = vld [vmem:[%s578_s0 + $0x80] ss:$16 sps:$4 sm:$0xff]   ;;  %v413_v20 = vld [vmem:[%s578_s0 + $0x88] ss:$16 sps:$4 sm:$0xff]   ;;  %v414_v21 = vld [vmem:[%s578_s0 + $0xa4] ss:$16 sps:$4 sm:$0xff]  }
   0x8   :  { %252 = vmatprep.subr.bf16.mxu0 %v396_v9  ;;  %293 = vmatprep.subr.bf16.mxu1 %v398_v10  ;;  %v416_v22 = vld [vmem:[%s578_s0 + $0xac] ss:$16 sps:$4 sm:$0xff]   ;;  %v418_v23 = vld [vmem:[%s578_s0 + $0xa0] ss:$16 sps:$4 sm:$0xff]   ;;  %v419_v24 = vld [vmem:[%s578_s0 + $0xa8] ss:$16 sps:$4 sm:$0xff]  }
   0x9   :  { %v420_v25 = vld [vmem:[%s578_s0 + $0xc4] ss:$16 sps:$4 sm:$0xff]   ;;  %v422_v26 = vld [vmem:[%s578_s0 + $0xcc] ss:$16 sps:$4 sm:$0xff]   ;;  %v424_v27 = vld [vmem:[%s578_s0 + $0xc0] ss:$16 sps:$4 sm:$0xff]  }
   0xa   :  { %v425_v28 = vld [vmem:[%s578_s0 + $0xc8] ss:$16 sps:$4 sm:$0xff]   ;;  %v15_v29 = vld [vmem:[%s579_s1] sm:$0xff]  ;;  %v428_v32 = vld [vmem:[%s578_s0 + $0xec] ss:$16 sps:$4 sm:$0xff]  }
   0xb   :  { %253 = vmatpush1.bf16.msra.mxu0 %v400_v11  ;;  %294 = vmatpush1.bf16.msra.mxu1 %v401_v12  ;;  %v52_v30 = vld [vmem:[%s580_s2] sm:$0xff]  ;;  %v343_v33 = vcombine.high %v15_v29, %v15_v29  ;;  %v431_v35 = vld [vmem:[%s578_s0 + $0xe8] ss:$16 sps:$4 sm:$0xff]   ;;  %v434_v37 = vld [vmem:[%s578_s0 + $0x10c] ss:$16 sps:$4 sm:$0xff]   ;;  %v342_v40 = vcombine.low %v15_v29, %v15_v29 }
   0xc   :  { %254 = vmatprep.subr.bf16.mxu0 %v402_v13  ;;  %295 = vmatprep.subr.bf16.mxu1 %v404_v14  ;;  %v426_v31 = vld [vmem:[%s578_s0 + $0xe4] ss:$16 sps:$4 sm:$0xff]   ;;  %v430_v34 = vld [vmem:[%s578_s0 + $0xe0] ss:$16 sps:$4 sm:$0xff]   ;;  %v437_v39 = vld [vmem:[%s578_s0 + $0x108] ss:$16 sps:$4 sm:$0xff]  }
   0xd   :  { %55 = vperm.xlu0 %383, %v52_v30   ;;  %380 = vmatprep.mubr.msk.bf16.mxu0 %vm244_vm0, %v343_v33  ;;  %v432_v36 = vld [vmem:[%s578_s0 + $0x104] ss:$16 sps:$4 sm:$0xff]   ;;  %v436_v38 = vld [vmem:[%s578_s0 + $0x100] ss:$16 sps:$4 sm:$0xff]  }
   0xe   :  { %381 = vmatprep.mubr.msk.bf16.mxu1 %vm244_vm0, %v343_v33 }
   0xf   :  { %255 = vmatpush1.bf16.msra.mxu0 %v406_v15  ;;  %296 = vmatpush1.bf16.msra.mxu1 %v407_v16 }
  0x10   :  { %256 = vmatprep.subr.bf16.mxu0 %v408_v17  ;;  %297 = vmatprep.subr.bf16.mxu1 %v410_v18 }
  0x13   :  { %257 = vmatpush1.bf16.msra.mxu0 %v412_v19  ;;  %298 = vmatpush1.bf16.msra.mxu1 %v413_v20 }
  0x14   :  { %258 = vmatprep.subr.bf16.mxu0 %v414_v21  ;;  %299 = vmatprep.subr.bf16.mxu1 %v416_v22 }
  0x17   :  { %259 = vmatpush1.bf16.msra.mxu0 %v418_v23  ;;  %300 = vmatpush1.bf16.msra.mxu1 %v419_v24 }
  0x18   :  { %260 = vmatprep.subr.bf16.mxu0 %v420_v25  ;;  %301 = vmatprep.subr.bf16.mxu1 %v422_v26 }
  0x1b   :  { %261 = vmatpush1.bf16.msra.mxu0 %v424_v27  ;;  %302 = vmatpush1.bf16.msra.mxu1 %v425_v28 }
  0x1c   :  { %262 = vmatprep.subr.bf16.mxu0 %v426_v31  ;;  %303 = vmatprep.subr.bf16.mxu1 %v428_v32 }
  0x1f   :  { %263 = vmatpush1.bf16.msra.mxu0 %v430_v34  ;;  %304 = vmatpush1.bf16.msra.mxu1 %v431_v35 }
  0x20   :  { %264 = vmatprep.subr.bf16.mxu0 %v432_v36  ;;  %305 = vmatprep.subr.bf16.mxu1 %v434_v37 }
  0x23   :  { %265 = vmatpush1.bf16.msra.mxu0 %v436_v38  ;;  %306 = vmatpush1.bf16.msra.mxu1 %v437_v39 }
  0x26   :  { %281 = vmatmul.mubr.bf16.vlgmr.msra.gmra.mrb[0].mxu0 %v342_v40  ;;  %322 = vmatmul.mubr.bf16.vlgmr.msra.gmra.mrb[0].mxu1 %v342_v40 }
  0x8c   :  { %v56_v41 = vpop.permute.xlu0 %55 }
  0xf9   :  { %v282_v42 = vpop.f32.mrb[0].mxu0  ;;  %v323_v43 = vpop.f32.mrb[0].mxu1 }
  0xfa   :  { %v283_v44 = vadd.f32 %v282_v42, %v56_v41  ;;  %v324_v45 = vadd.f32 %v323_v43, %v56_v41  ;;  %v284_v46 = vpop.f32.mrb[1].mxu0  ;;  %v325_v47 = vpop.f32.mrb[1].mxu1 }
  0xfb   :  { %v285_v48 = vadd.f32 %v284_v46, %v56_v41  ;;  %v326_v49 = vadd.f32 %v325_v47, %v56_v41  ;;  %v286_v50 = vpop.f32.mrb[2].mxu0  ;;  %v327_v51 = vpop.f32.mrb[2].mxu1 }
  0xfc   :  { %v330_v52 = vmax.f32 %v283_v44, 0.0  ;;  %v332_v53 = vmax.f32 %v324_v45, 0.0  ;;  %v287_v54 = vpop.f32.mrb[3].mxu0  ;;  %v328_v55 = vpop.f32.mrb[3].mxu1 }
  0xfd   :  { %v331_v56 = vmax.f32 %v285_v48, 0.0  ;;  %v333_v57 = vmax.f32 %v326_v49, 0.0 }
  0xff   :  { %v334_v58 = vmax.f32 %v330_v52, %v331_v56  ;;  %v335_v59 = vmax.f32 %v332_v53, %v333_v57 }
 0x101   :  { %v336_v60 = vmax.f32 %v334_v58, %v335_v59 }
 0x103   :  { %337 = vst [vmem:[%s581_s3] sm:$0xff] %v336_v60 }

// kernel: autoencoder_forward.7
= control target key start
LH: loop header
LB: loop body
LE: loop exit
PB: predicated region body
PF: predicated region fallthrough
CT: control target
= control target key end

     0   :  { %v366_v1 = vmov 0.0   ;;  %vm367_vm0 = vmmov 0   ;;  %v368_v3 = vmov 0   ;;  %vm190_vm1 = vcmask 261120   ;;  %s464_s0 = inlined_call_operand.vmem [shape: bf16[288,98], index: 0, kind: input, shape index: {}]   ;;  %s465_s1 = inlined_call_operand.vmem [shape: bf16[16,288], index: 1, kind: input, shape index: {}]   ;;  %s466_s2 = inlined_call_operand.vmem [shape: f32[16,1], index: 2, kind: input, shape index: {}]   ;;  %s467_s3 = inlined_call_operand.vmem [shape: f32[16,98], index: 3, kind: output, shape index: {}]  }
   0x1   :  { %v344_v0 = vld [vmem:[%s464_s0 + $0x40] sm:$0xff]   ;;  %332 = vmatprep.subr.bf16.mxu1 %v366_v1  ;;  %336 = vmatprep.mubr.msk.bf16.mxu1 %vm367_vm0, %v366_v1  ;;  %v346_v4 = vld [vmem:[%s464_s0 + $0x48] sm:$0xff]   ;;  %v348_v6 = vld [vmem:[%s464_s0 + $0x50] sm:$0xff]   ;;  %vm278_vm2 = vcmask 801792  }
   0x2   :  { %v345_v2 = vld [vmem:[%s464_s0] sm:$0xff]   ;;  %343 = vset.pattern.permute.xlu0 %v368_v3  ;;  %307 = vmatprep.subr.bf16.mxu0 %v344_v0  ;;  %v347_v5 = vld [vmem:[%s464_s0 + $0x8] sm:$0xff]   ;;  %v349_v7 = vld [vmem:[%s464_s0 + $0x10] sm:$0xff]  }
   0x3   :  { %308 = vmatpush3.bf16.msra.mxu0 %v345_v2  ;;  %v350_v8 = vld [vmem:[%s464_s0 + $0x58] sm:$0xff]   ;;  %v352_v10 = vld [vmem:[%s464_s0 + $0x60] sm:$0xff]   ;;  %v354_v13 = vld [vmem:[%s464_s0 + $0x68] sm:$0xff]  }
   0x4   :  { %309 = vmatprep.subr.bf16.mxu0 %v346_v4  ;;  %v351_v9 = vld [vmem:[%s464_s0 + $0x18] sm:$0xff]   ;;  %v358_v11 = vld [vmem:[%s464_s0 + $0x80] sm:$0xff]   ;;  %v355_v14 = vld [vmem:[%s464_s0 + $0x28] sm:$0xff]  }
   0x5   :  { %v353_v12 = vld [vmem:[%s464_s0 + $0x20] sm:$0xff]   ;;  %333 = vmatpush3.bf16.msra.mxu1 %v358_v11  ;;  %v364_v16 = vld [vmem:[%s464_s0 + $0x88] sm:$0xff]   ;;  %v356_v17 = vld [vmem:[%s464_s0 + $0x70] sm:$0xff]  }
   0x6   :  { %334 = vmatprep.subr.bf16.mxu1 %v366_v1  ;;  %v363_v15 = vld [vmem:[%s465_s1 + $0x4] ss:$12 sps:$4 sm:$0xff]   ;;  %v365_v18 = vld [vmem:[%s465_s1 + $0x8] ss:$12 sps:$4 sm:$0xff]   ;;  %v359_v22 = vld [vmem:[%s464_s0 + $0x78] sm:$0xff]  }
   0x7   :  { %310 = vmatpush3.bf16.msra.mxu0 %v347_v5  ;;  %226 = vmatprep.mubr.bf16.mxu0 %v363_v15  ;;  %v55_v19 = vld [vmem:[%s466_s2] sm:$0xff]  ;;  %v56_v20 = vld [vmem:[%s466_s2 + $0x8] sm:$0xff]  ;;  %v357_v21 = vld [vmem:[%s464_s0 + $0x30] sm:$0xff]  }
   0x8   :  { %311 = vmatprep.subr.bf16.mxu0 %v348_v6  ;;  %59 = vperm.xlu0 %343, %v55_v19   ;;  %v360_v23 = vld [vmem:[%s464_s0 + $0x38] sm:$0xff]   ;;  %v361_v24 = vld [vmem:[%s465_s1] ss:$12 sps:$4 sm:$0xff]  }
   0x9   :  { %335 = vmatpush3.bf16.msra.mxu1 %v364_v16 }
   0xb   :  { %312 = vmatpush3.bf16.msra.mxu0 %v349_v7 }
   0xc   :  { %313 = vmatprep.subr.bf16.mxu0 %v350_v8  ;;  %337 = vmatmul.mubr.msk.bf16.vlgmr.msra.gmra.mrb[0].mxu1 %vm190_vm1, %v365_v18 }
   0xd   :  { %64 = vperm.xlu0 %343, %v56_v20  }
   0xf   :  { %314 = vmatpush3.bf16.msra.mxu0 %v351_v9 }
  0x10   :  { %315 = vmatprep.subr.bf16.mxu0 %v352_v10 }
  0x13   :  { %316 = vmatpush3.bf16.msra.mxu0 %v353_v12 }
  0x14   :  { %317 = vmatprep.subr.bf16.mxu0 %v354_v13 }
  0x17   :  { %318 = vmatpush3.bf16.msra.mxu0 %v355_v14 }
  0x18   :  { %319 = vmatprep.subr.bf16.mxu0 %v356_v17 }
  0x1b   :  { %320 = vmatpush3.bf16.msra.mxu0 %v357_v21 }
  0x1c   :  { %321 = vmatprep.subr.bf16.mxu0 %v359_v22 }
  0x1f   :  { %322 = vmatpush3.bf16.msra.mxu0 %v360_v23 }
  0x22   :  { %227 = vmatmul.mubr.bf16.vlgmr.msra.gmra.mrb[0].mxu0 %v361_v24 }
  0x87   :  { %v60_v29 = vpop.permute.xlu0 %59 }
  0x8c   :  { %v65_v37 = vpop.permute.xlu0 %64 }
  0xdf   :  { %v269_v25 = vpop.f32.mrb[0].mxu1 }
  0xe0   :  { %v338_v26 = vpop.f32.mrb[1].mxu1 }
  0xe1   :  { %v272_v27 = vpop.f32.mrb[2].mxu1 }
  0xe2   :  { %v339_v28 = vpop.f32.mrb[3].mxu1 }
  0xf5   :  { %v323_v30 = vpop.f32.mrb[0].mxu0 }
  0xf6   :  { %v324_v31 = vpop.f32.mrb[1].mxu0 }
  0xf7   :  { %v325_v32 = vadd.f32 %v324_v31, %v323_v30  ;;  %v326_v33 = vpop.f32.mrb[2].mxu0 }
  0xf8   :  { %v327_v34 = vpop.f32.mrb[3].mxu0 }
  0xf9   :  { %v229_v35 = vadd.f32 %v325_v32, %v60_v29  ;;  %v328_v36 = vadd.f32 %v327_v34, %v326_v33 }
  0xfb   :  { %v270_v38 = vadd.f32 %v269_v25, %v229_v35  ;;  %v232_v39 = vadd.f32 %v328_v36, %v65_v37 }
  0xfd   :  { %v276_v40 = vmax.f32 %v270_v38, 0.0  ;;  %v273_v41 = vadd.f32 %v272_v27, %v232_v39 }
  0xff   :  { %279 = vst.msk [vmem:[%s467_s3] sm:$0xff] %vm278_vm2, %v276_v40  ;;  %v277_v42 = vmax.f32 %v273_v41, 0.0 }
 0x101   :  { %280 = vst.msk [vmem:[%s467_s3 + $0x8] sm:$0xff] %vm278_vm2, %v277_v42 }

// kernel: autoencoder_forward.8
= control target key start
LH: loop header
LB: loop body
LE: loop exit
PB: predicated region body
PF: predicated region fallthrough
CT: control target
= control target key end

     0   :  { %v1356_v1 = vmov 0   ;;  %vm761_vm0 = vcmask 523264   ;;  %vm1358_vm1 = vmmov 0   ;;  %vm1013_vm2 = vcmask 261120   ;;  %s1734_s0 = inlined_call_operand.vmem [shape: bf16[576,288], index: 0, kind: input, shape index: {}]   ;;  %s1735_s1 = inlined_call_operand.vmem [shape: bf16[8,576], index: 1, kind: input, shape index: {}]   ;;  %s1736_s2 = inlined_call_operand.vmem [shape: f32[8,1], index: 2, kind: input, shape index: {}]   ;;  %s1737_s3 = inlined_call_operand.vmem [shape: f32[8,288], index: 3, kind: output, shape index: {}]  }
   0x1   :  { %v1207_v0 = vld [vmem:[%s1734_s0 + $0x4] ss:$12 sps:$4 sm:$0xff]   ;;  %879 = vmatprep.mubr.bf16.mxu1 %v1356_v1  ;;  %1206 = vset.pattern.permute.xlu0 %v1356_v1  ;;  %v1211_v3 = vld [vmem:[%s1734_s0] ss:$12 sps:$4 sm:$0xff]   ;;  %v1213_v5 = vld [vmem:[%s1734_s0 + $0x1c] ss:$12 sps:$4 sm:$0xff]  }
   0x2   :  { %v1209_v2 = vld [vmem:[%s1734_s0 + $0x304] ss:$12 sps:$4 sm:$0xff]   ;;  %765 = vmatprep.subr.bf16.mxu0 %v1207_v0  ;;  %v1212_v4 = vld [vmem:[%s1734_s0 + $0x300] ss:$12 sps:$4 sm:$0xff]   ;;  %v1215_v6 = vld [vmem:[%s1734_s0 + $0x31c] ss:$12 sps:$4 sm:$0xff]  }
   0x3   :  { %847 = vmatprep.subr.bf16.mxu1 %v1209_v2  ;;  %766 = vmatpush1.bf16.msra.mxu0 %v1211_v3  ;;  %v1217_v7 = vld [vmem:[%s1734_s0 + $0x18] ss:$12 sps:$4 sm:$0xff]   ;;  %v1219_v9 = vld [vmem:[%s1734_s0 + $0x34] ss:$12 sps:$4 sm:$0xff]   ;;  %v1223_v11 = vld [vmem:[%s1734_s0 + $0x30] ss:$12 sps:$4 sm:$0xff]  }
   0x4   :  { %848 = vmatpush1.bf16.msra.mxu1 %v1212_v4  ;;  %767 = vmatprep.subr.bf16.mxu0 %v1213_v5  ;;  %v1218_v8 = vld [vmem:[%s1734_s0 + $0x318] ss:$12 sps:$4 sm:$0xff]   ;;  %v1221_v10 = vld [vmem:[%s1734_s0 + $0x334] ss:$12 sps:$4 sm:$0xff]   ;;  %v1224_v12 = vld [vmem:[%s1734_s0 + $0x330] ss:$12 sps:$4 sm:$0xff]  }
   0x5   :  { %849 = vmatprep.subr.bf16.mxu1 %v1215_v6  ;;  %v1225_v13 = vld [vmem:[%s1734_s0 + $0x4c] ss:$12 sps:$4 sm:$0xff]   ;;  %v1229_v15 = vld [vmem:[%s1734_s0 + $0x48] ss:$12 sps:$4 sm:$0xff]   ;;  %v1231_v17 = vld [vmem:[%s1734_s0 + $0x64] ss:$12 sps:$4 sm:$0xff]  }
   0x6   :  { %v1227_v14 = vld [vmem:[%s1734_s0 + $0x34c] ss:$12 sps:$4 sm:$0xff]   ;;  %v1230_v16 = vld [vmem:[%s1734_s0 + $0x348] ss:$12 sps:$4 sm:$0xff]   ;;  %v1439_v20 = vld [vmem:[%s1735_s1 + $0x10] ss:$0 sps:$4 sm:$0xff]  }
   0x7   :  { %768 = vmatpush1.bf16.msra.mxu0 %v1217_v7  ;;  %v1233_v18 = vld [vmem:[%s1734_s0 + $0xc8] ss:$12 sps:$4 sm:$0xff]   ;;  %v1234_v19 = vld [vmem:[%s1734_s0 + $0x60] ss:$12 sps:$4 sm:$0xff]   ;;  %v1240_v24 = vld [vmem:[%s1734_s0 + $0x78] ss:$12 sps:$4 sm:$0xff]  }
   0x8   :  { %850 = vmatpush1.bf16.msra.mxu1 %v1218_v8  ;;  %769 = vmatprep.subr.bf16.mxu0 %v1219_v9  ;;  %v1236_v21 = vld [vmem:[%s1734_s0 + $0x8] ss:$12 sps:$4 sm:$0xff]   ;;  %v1239_v23 = vld [vmem:[%s1734_s0 + $0xe0] ss:$12 sps:$4 sm:$0xff]   ;;  %v1244_v27 = vld [vmem:[%s1734_s0 + $0xf8] ss:$12 sps:$4 sm:$0xff]  }
   0x9   :  { %851 = vmatprep.subr.bf16.mxu1 %v1221_v10  ;;  %v1237_v22 = vld [vmem:[%s1734_s0 + $0x7c] ss:$12 sps:$4 sm:$0xff]   ;;  %v1241_v25 = vld [vmem:[%s1734_s0 + $0x20] ss:$12 sps:$4 sm:$0xff]   ;;  %v1246_v29 = vld [vmem:[%s1734_s0 + $0x38] ss:$12 sps:$4 sm:$0xff]  }
   0xa   :  { %v1242_v26 = vld [vmem:[%s1734_s0 + $0x94] ss:$12 sps:$4 sm:$0xff]   ;;  %v1245_v28 = vld [vmem:[%s1734_s0 + $0x90] ss:$12 sps:$4 sm:$0xff]   ;;  %v1247_v30 = vld [vmem:[%s1734_s0 + $0xac] ss:$12 sps:$4 sm:$0xff]  }
   0xb   :  { %770 = vmatpush1.bf16.msra.mxu0 %v1223_v11  ;;  %v1249_v31 = vld [vmem:[%s1734_s0 + $0x110] ss:$12 sps:$4 sm:$0xff]   ;;  %v1250_v32 = vld [vmem:[%s1734_s0 + $0xa8] ss:$12 sps:$4 sm:$0xff]   ;;  %v1255_v36 = vld [vmem:[%s1734_s0 + $0xc0] ss:$12 sps:$4 sm:$0xff]  }
   0xc   :  { %852 = vmatpush1.bf16.msra.mxu1 %v1224_v12  ;;  %771 = vmatprep.subr.bf16.mxu0 %v1225_v13  ;;  %v1251_v33 = vld [vmem:[%s1734_s0 + $0x50] ss:$12 sps:$4 sm:$0xff]   ;;  %v1254_v35 = vld [vmem:[%s1734_s0 + $0x128] ss:$12 sps:$4 sm:$0xff]   ;;  %v1259_v39 = vld [vmem:[%s1734_s0 + $0x140] ss:$12 sps:$4 sm:$0xff]  }
   0xd   :  { %853 = vmatprep.subr.bf16.mxu1 %v1227_v14  ;;  %v1252_v34 = vld [vmem:[%s1734_s0 + $0xc4] ss:$12 sps:$4 sm:$0xff]   ;;  %v1256_v37 = vld [vmem:[%s1734_s0 + $0x68] ss:$12 sps:$4 sm:$0xff]   ;;  %v1261_v41 = vld [vmem:[%s1734_s0 + $0x80] ss:$12 sps:$4 sm:$0xff]  }
   0xe   :  { %v1257_v38 = vld [vmem:[%s1734_s0 + $0xdc] ss:$12 sps:$4 sm:$0xff]   ;;  %v1260_v40 = vld [vmem:[%s1734_s0 + $0xd8] ss:$12 sps:$4 sm:$0xff]   ;;  %v1262_v42 = vld [vmem:[%s1734_s0 + $0xf4] ss:$12 sps:$4 sm:$0xff]  }
   0xf   :  { %772 = vmatpush1.bf16.msra.mxu0 %v1229_v15  ;;  %v1264_v43 = vld [vmem:[%s1734_s0 + $0x158] ss:$12 sps:$4 sm:$0xff]   ;;  %v1265_v44 = vld [vmem:[%s1734_s0 + $0xf0] ss:$12 sps:$4 sm:$0xff]   ;;  %v1270_v50 = vld [vmem:[%s1734_s0 + $0x108] ss:$12 sps:$4 sm:$0xff]  }
  0x10   :  { %854 = vmatpush1.bf16.msra.mxu1 %v1230_v16  ;;  %773 = vmatprep.subr.bf16.mxu0 %v1231_v17  ;;  %v15_v45 = vld [vmem:[%s1735_s1] sm:$0xff]  ;;  %v1267_v47 = vld [vmem:[%s1734_s0 + $0x10c] ss:$12 sps:$4 sm:$0xff]   ;;  %v1269_v49 = vld [vmem:[%s1734_s0 + $0x170] ss:$12 sps:$4 sm:$0xff]  }
  0x11   :  { %1134 = vmatprep.subr.bf16.mxu1 %v1233_v18  ;;  %v1266_v46 = vld [vmem:[%s1734_s0 + $0x98] ss:$12 sps:$4 sm:$0xff]   ;;  %v1020_v48 = vcombine.high %v15_v45, %v15_v45  ;;  %v1271_v51 = vld [vmem:[%s1734_s0 + $0xb0] ss:$12 sps:$4 sm:$0xff]   ;;  %v1276_v53 = vld [vmem:[%s1734_s0 + $0x248] ss:$12 sps:$4 sm:$0xff]   ;;  %v1019_v55 = vcombine.low %v15_v45, %v15_v45 }
  0x12   :  { %v1272_v52 = vld [vmem:[%s1734_s0 + $0x124] ss:$12 sps:$4 sm:$0xff]   ;;  %v1277_v54 = vld [vmem:[%s1734_s0 + $0x120] ss:$12 sps:$4 sm:$0xff]   ;;  %v1278_v56 = vld [vmem:[%s1734_s0 + $0x188] ss:$12 sps:$4 sm:$0xff]  }
  0x13   :  { %1132 = vmatmul.mubr.msk.bf16.vlgmr.msra.gmra.mrb[0].mxu1 %vm761_vm0, %v1439_v20  ;;  %774 = vmatpush1.bf16.msra.mxu0 %v1234_v19  ;;  %v1279_v57 = vld [vmem:[%s1734_s0 + $0x13c] ss:$12 sps:$4 sm:$0xff]   ;;  %v1281_v58 = vld [vmem:[%s1734_s0 + $0x260] ss:$12 sps:$4 sm:$0xff]   ;;  %v1282_v59 = vld [vmem:[%s1734_s0 + $0x138] ss:$12 sps:$4 sm:$0xff]  }
  0x14   :  { %1135 = vmatpush3.bf16.msra.mxu1 %v1236_v21  ;;  %775 = vmatprep.subr.bf16.mxu0 %v1237_v22  ;;  %v1283_v60 = vld [vmem:[%s1734_s0 + $0x1a0] ss:$12 sps:$4 sm:$0xff]   ;;  %v1286_v62 = vld [vmem:[%s1734_s0 + $0x278] ss:$12 sps:$4 sm:$0xff]   ;;  %v1287_v63 = vld [vmem:[%s1734_s0 + $0x150] ss:$12 sps:$4 sm:$0xff]  }
  0x15   :  { %1136 = vmatprep.subr.bf16.mxu1 %v1239_v23  ;;  %920 = vmatprep.mubr.bf16.mxu1 %v1020_v48  ;;  %v1284_v61 = vld [vmem:[%s1734_s0 + $0x154] ss:$12 sps:$4 sm:$0xff]   ;;  %v1288_v0 = vld [vmem:[%s1734_s0 + $0x1b8] ss:$12 sps:$4 sm:$0xff]   ;;  %v1291_v2 = vld [vmem:[%s1734_s0 + $0x290] ss:$12 sps:$4 sm:$0xff]  }
  0x16   :  { %797 = vmatprep.mubr.bf16.mxu0 %v1020_v48  ;;  %v1289_v1 = vld [vmem:[%s1734_s0 + $0x16c] ss:$12 sps:$4 sm:$0xff]   ;;  %v1292_v3 = vld [vmem:[%s1734_s0 + $0x168] ss:$12 sps:$4 sm:$0xff]   ;;  %v1293_v4 = vld [vmem:[%s1734_s0 + $0x1d0] ss:$12 sps:$4 sm:$0xff]  }
  0x17   :  { %776 = vmatpush1.bf16.msra.mxu0 %v1240_v24  ;;  %v1296_v5 = vld [vmem:[%s1734_s0 + $0x184] ss:$12 sps:$4 sm:$0xff]   ;;  %v1297_v6 = vld [vmem:[%s1734_s0 + $0x2a8] ss:$12 sps:$4 sm:$0xff]   ;;  %v1294_v7 = vld [vmem:[%s1734_s0 + $0x180] ss:$12 sps:$4 sm:$0xff]  }
  0x18   :  { %1137 = vmatpush3.bf16.msra.mxu1 %v1241_v25  ;;  %777 = vmatprep.subr.bf16.mxu0 %v1242_v26  ;;  %v1298_v8 = vld [vmem:[%s1734_s0 + $0x1e8] ss:$12 sps:$4 sm:$0xff]   ;;  %v1302_v10 = vld [vmem:[%s1734_s0 + $0x2c0] ss:$12 sps:$4 sm:$0xff]   ;;  %v1299_v12 = vld [vmem:[%s1734_s0 + $0x198] ss:$12 sps:$4 sm:$0xff]  }
  0x19   :  { %1138 = vmatprep.subr.bf16.mxu1 %v1244_v27  ;;  %v1301_v9 = vld [vmem:[%s1734_s0 + $0x19c] ss:$12 sps:$4 sm:$0xff]   ;;  %v1303_v14 = vld [vmem:[%s1734_s0 + $0x200] ss:$12 sps:$4 sm:$0xff]   ;;  %v1307_v16 = vld [vmem:[%s1734_s0 + $0x2d8] ss:$12 sps:$4 sm:$0xff]  }
  0x1a   :  { %v16_v11 = vld [vmem:[%s1735_s1 + $0x8] sm:$0xff]  ;;  %v1306_v15 = vld [vmem:[%s1734_s0 + $0x1b4] ss:$12 sps:$4 sm:$0xff]   ;;  %v1304_v17 = vld [vmem:[%s1734_s0 + $0x1b0] ss:$12 sps:$4 sm:$0xff]  }
  0x1b   :  { %778 = vmatpush1.bf16.msra.mxu0 %v1245_v28  ;;  %v1022_v13 = vcombine.high %v16_v11, %v16_v11  ;;  %v1308_v18 = vld [vmem:[%s1734_s0 + $0x218] ss:$12 sps:$4 sm:$0xff]   ;;  %v1312_v21 = vld [vmem:[%s1734_s0 + $0x2f0] ss:$12 sps:$4 sm:$0xff]   ;;  %v1309_v22 = vld [vmem:[%s1734_s0 + $0x1c8] ss:$12 sps:$4 sm:$0xff]   ;;  %v1638_v26 = vcombine.low %v16_v11, %v16_v11 }
  0x1c   :  { %1139 = vmatpush3.bf16.msra.mxu1 %v1246_v29  ;;  %779 = vmatprep.subr.bf16.mxu0 %v1247_v30  ;;  %v1311_v19 = vld [vmem:[%s1734_s0 + $0x1cc] ss:$12 sps:$4 sm:$0xff]   ;;  %v1313_v23 = vld [vmem:[%s1734_s0 + $0x230] ss:$12 sps:$4 sm:$0xff]   ;;  %v1319_v27 = vld [vmem:[%s1734_s0 + $0x308] ss:$12 sps:$4 sm:$0xff]  }
  0x1d   :  { %1140 = vmatprep.subr.bf16.mxu1 %v1249_v31  ;;  %v1316_v24 = vld [vmem:[%s1734_s0 + $0x1e4] ss:$12 sps:$4 sm:$0xff]   ;;  %v1314_v25 = vld [vmem:[%s1734_s0 + $0x1e0] ss:$12 sps:$4 sm:$0xff]   ;;  %v1357_v28 = vmov 0.0  }
  0x1e   :  { %v1322_v29 = vld [vmem:[%s1734_s0 + $0x1fc] ss:$12 sps:$4 sm:$0xff]   ;;  %v1320_v30 = vld [vmem:[%s1734_s0 + $0x1f8] ss:$12 sps:$4 sm:$0xff]   ;;  %v1323_v31 = vld [vmem:[%s1734_s0 + $0x320] ss:$12 sps:$4 sm:$0xff]  }
  0x1f   :  { %780 = vmatpush1.bf16.msra.mxu0 %v1250_v32  ;;  %v1326_v32 = vld [vmem:[%s1734_s0 + $0x214] ss:$12 sps:$4 sm:$0xff]   ;;  %v1349_v48 = vld [vmem:[%s1734_s0 + $0x2bc] ss:$12 sps:$4 sm:$0xff]  }
  0x20   :  { %1141 = vmatpush3.bf16.msra.mxu1 %v1251_v33  ;;  %781 = vmatprep.subr.bf16.mxu0 %v1252_v34  ;;  %v162_v33 = vld [vmem:[%s1736_s2] sm:$0xff]  ;;  %v1324_v34 = vld [vmem:[%s1734_s0 + $0x210] ss:$12 sps:$4 sm:$0xff]   ;;  %v1341_v45 = vld [vmem:[%s1734_s0 + $0x288] ss:$12 sps:$4 sm:$0xff]  }
  0x21   :  { %1142 = vmatprep.subr.bf16.mxu1 %v1254_v35  ;;  %165 = vperm.xlu0 %1206, %v162_v33   ;;  %v1327_v35 = vld [vmem:[%s1734_s0 + $0x338] ss:$12 sps:$4 sm:$0xff]  }
  0x23   :  { %782 = vmatpush1.bf16.msra.mxu0 %v1255_v36  ;;  %v1330_v36 = vld [vmem:[%s1734_s0 + $0x22c] ss:$12 sps:$4 sm:$0xff]  }
  0x24   :  { %1143 = vmatpush3.bf16.msra.mxu1 %v1256_v37  ;;  %783 = vmatprep.subr.bf16.mxu0 %v1257_v38  ;;  %v1328_v37 = vld [vmem:[%s1734_s0 + $0x228] ss:$12 sps:$4 sm:$0xff]   ;;  %v1331_v38 = vld [vmem:[%s1734_s0 + $0x350] ss:$12 sps:$4 sm:$0xff]  }
  0x25   :  { %1144 = vmatprep.subr.bf16.mxu1 %v1259_v39  ;;  %v1334_v39 = vld [vmem:[%s1734_s0 + $0x244] ss:$12 sps:$4 sm:$0xff]  }
  0x27   :  { %784 = vmatpush1.bf16.msra.mxu0 %v1260_v40  ;;  %v1332_v40 = vld [vmem:[%s1734_s0 + $0x240] ss:$12 sps:$4 sm:$0xff]  }
  0x28   :  { %1145 = vmatpush3.bf16.msra.mxu1 %v1261_v41  ;;  %785 = vmatprep.subr.bf16.mxu0 %v1262_v42  ;;  %v1337_v41 = vld [vmem:[%s1734_s0 + $0x25c] ss:$12 sps:$4 sm:$0xff]   ;;  %v1335_v42 = vld [vmem:[%s1734_s0 + $0x258] ss:$12 sps:$4 sm:$0xff]  }
  0x29   :  { %1146 = vmatprep.subr.bf16.mxu1 %v1264_v43  ;;  %v1340_v43 = vld [vmem:[%s1734_s0 + $0x274] ss:$12 sps:$4 sm:$0xff]  }
  0x2b   :  { %786 = vmatpush1.bf16.msra.mxu0 %v1265_v44  ;;  %v1338_v44 = vld [vmem:[%s1734_s0 + $0x270] ss:$12 sps:$4 sm:$0xff]  }
  0x2c   :  { %1147 = vmatpush3.bf16.msra.mxu1 %v1266_v46  ;;  %787 = vmatprep.subr.bf16.mxu0 %v1267_v47  ;;  %v1346_v46 = vld [vmem:[%s1734_s0 + $0x2a4] ss:$12 sps:$4 sm:$0xff]   ;;  %v1344_v47 = vld [vmem:[%s1734_s0 + $0x2a0] ss:$12 sps:$4 sm:$0xff]  }
  0x2d   :  { %1148 = vmatprep.subr.bf16.mxu1 %v1269_v49  ;;  %v1347_v49 = vld [vmem:[%s1734_s0 + $0x2b8] ss:$12 sps:$4 sm:$0xff]  }
  0x2f   :  { %788 = vmatpush1.bf16.msra.mxu0 %v1270_v50  ;;  %v1352_v50 = vld [vmem:[%s1734_s0 + $0x2d4] ss:$12 sps:$4 sm:$0xff]  }
  0x30   :  { %1149 = vmatpush3.bf16.msra.mxu1 %v1271_v51  ;;  %789 = vmatprep.subr.bf16.mxu0 %v1272_v52  ;;  %v1350_v51 = vld [vmem:[%s1734_s0 + $0x2d0] ss:$12 sps:$4 sm:$0xff]   ;;  %v1355_v52 = vld [vmem:[%s1734_s0 + $0x2ec] ss:$12 sps:$4 sm:$0xff]  }
  0x31   :  { %1156 = vmatprep.subr.bf16.mxu1 %v1276_v53  ;;  %v1353_v53 = vld [vmem:[%s1734_s0 + $0x2e8] ss:$12 sps:$4 sm:$0xff]  }
  0x33   :  { %921 = vmatmul.mubr.bf16.vlgmr.msra.gmra.mrb[4].mxu1 %v1019_v55  ;;  %790 = vmatpush1.bf16.msra.mxu0 %v1277_v54 }
  0x34   :  { %1157 = vmatpush3.bf16.msra.mxu1 %v1278_v56  ;;  %791 = vmatprep.subr.bf16.mxu0 %v1279_v57 }
  0x35   :  { %1158 = vmatprep.subr.bf16.mxu1 %v1281_v58  ;;  %960 = vmatprep.mubr.bf16.mxu1 %v1022_v13 }
  0x37   :  { %792 = vmatpush1.bf16.msra.mxu0 %v1282_v59 }
  0x38   :  { %1159 = vmatpush3.bf16.msra.mxu1 %v1283_v60  ;;  %793 = vmatprep.subr.bf16.mxu0 %v1284_v61 }
  0x39   :  { %1160 = vmatprep.subr.bf16.mxu1 %v1286_v62 }
  0x3b   :  { %794 = vmatpush1.bf16.msra.mxu0 %v1287_v63 }
  0x3c   :  { %1161 = vmatpush3.bf16.msra.mxu1 %v1288_v0  ;;  %795 = vmatprep.subr.bf16.mxu0 %v1289_v1 }
  0x3d   :  { %1162 = vmatprep.subr.bf16.mxu1 %v1291_v2 }
  0x3f   :  { %796 = vmatpush1.bf16.msra.mxu0 %v1292_v3 }
  0x40   :  { %1163 = vmatpush3.bf16.msra.mxu1 %v1293_v4  ;;  %806 = vmatprep.subr.bf16.mxu0 %v1296_v5 }
  0x41   :  { %1164 = vmatprep.subr.bf16.mxu1 %v1297_v6 }
  0x42   :  { %798 = vmatmul.mubr.bf16.vlgmr.msra.gmra.mrb[0].mxu0 %v1019_v55 }
  0x43   :  { %807 = vmatpush1.bf16.msra.mxu0 %v1294_v7  ;;  %838 = vmatprep.mubr.bf16.mxu0 %v1022_v13 }
  0x44   :  { %1165 = vmatpush3.bf16.msra.mxu1 %v1298_v8  ;;  %808 = vmatprep.subr.bf16.mxu0 %v1301_v9 }
  0x45   :  { %1166 = vmatprep.subr.bf16.mxu1 %v1302_v10 }
  0x47   :  { %809 = vmatpush1.bf16.msra.mxu0 %v1299_v12 }
  0x48   :  { %1167 = vmatpush3.bf16.msra.mxu1 %v1303_v14  ;;  %810 = vmatprep.subr.bf16.mxu0 %v1306_v15 }
  0x49   :  { %1168 = vmatprep.subr.bf16.mxu1 %v1307_v16 }
  0x4b   :  { %811 = vmatpush1.bf16.msra.mxu0 %v1304_v17 }
  0x4c   :  { %1169 = vmatpush3.bf16.msra.mxu1 %v1308_v18  ;;  %812 = vmatprep.subr.bf16.mxu0 %v1311_v19 }
  0x4d   :  { %1170 = vmatprep.subr.bf16.mxu1 %v1312_v21 }
  0x4f   :  { %813 = vmatpush1.bf16.msra.mxu0 %v1309_v22 }
  0x50   :  { %1171 = vmatpush3.bf16.msra.mxu1 %v1313_v23  ;;  %814 = vmatprep.subr.bf16.mxu0 %v1316_v24 }
  0x51   :  { %1183 = vmatprep.subr.bf16.mxu1 %v1357_v28 }
  0x53   :  { %961 = vmatmul.mubr.bf16.vlgmr.msra.gmra.mrb[8].mxu1 %v1638_v26  ;;  %815 = vmatpush1.bf16.msra.mxu0 %v1314_v25 }
  0x54   :  { %1184 = vmatpush3.bf16.msra.mxu1 %v1319_v27  ;;  %816 = vmatprep.subr.bf16.mxu0 %v1322_v29 }
  0x55   :  { %1185 = vmatprep.subr.bf16.mxu1 %v1357_v28  ;;  %1191 = vmatprep.mubr.msk.bf16.mxu1 %vm1358_vm1, %v1357_v28 }
  0x57   :  { %817 = vmatpush1.bf16.msra.mxu0 %v1320_v30 }
  0x58   :  { %1186 = vmatpush3.bf16.msra.mxu1 %v1323_v31  ;;  %818 = vmatprep.subr.bf16.mxu0 %v1326_v32 }
  0x59   :  { %1187 = vmatprep.subr.bf16.mxu1 %v1357_v28 }
  0x5b   :  { %819 = vmatpush1.bf16.msra.mxu0 %v1324_v34 }
  0x5c   :  { %1188 = vmatpush3.bf16.msra.mxu1 %v1327_v35  ;;  %820 = vmatprep.subr.bf16.mxu0 %v1330_v36 }
  0x5d   :  { %1189 = vmatprep.subr.bf16.mxu1 %v1357_v28 }
  0x5f   :  { %821 = vmatpush1.bf16.msra.mxu0 %v1328_v37 }
  0x60   :  { %1190 = vmatpush3.bf16.msra.mxu1 %v1331_v38  ;;  %822 = vmatprep.subr.bf16.mxu0 %v1334_v39 }
  0x63   :  { %1192 = vmatmul.mubr.msk.bf16.vlgmr.msra.gmra.mrb[12].mxu1 %vm761_vm0, %v1439_v20  ;;  %823 = vmatpush1.bf16.msra.mxu0 %v1332_v40  ;;  %v1343_v20 = vld [vmem:[%s1734_s0 + $0x28c] ss:$12 sps:$4 sm:$0xff]  }
  0x64   :  { %824 = vmatprep.subr.bf16.mxu0 %v1337_v41 }
  0x67   :  { %825 = vmatpush1.bf16.msra.mxu0 %v1335_v42 }
  0x68   :  { %826 = vmatprep.subr.bf16.mxu0 %v1340_v43 }
  0x6b   :  { %827 = vmatpush1.bf16.msra.mxu0 %v1338_v44 }
  0x6c   :  { %828 = vmatprep.subr.bf16.mxu0 %v1343_v20 }
  0x6f   :  { %829 = vmatpush1.bf16.msra.mxu0 %v1341_v45 }
  0x70   :  { %830 = vmatprep.subr.bf16.mxu0 %v1346_v46 }
  0x73   :  { %831 = vmatpush1.bf16.msra.mxu0 %v1344_v47 }
  0x74   :  { %832 = vmatprep.subr.bf16.mxu0 %v1349_v48 }
  0x77   :  { %833 = vmatpush1.bf16.msra.mxu0 %v1347_v49 }
  0x78   :  { %834 = vmatprep.subr.bf16.mxu0 %v1352_v50 }
  0x7b   :  { %835 = vmatpush1.bf16.msra.mxu0 %v1350_v51 }
  0x7c   :  { %836 = vmatprep.subr.bf16.mxu0 %v1355_v52 }
  0x7f   :  { %837 = vmatpush1.bf16.msra.mxu0 %v1353_v53 }
  0x82   :  { %839 = vmatmul.mubr.bf16.vlgmr.msra.gmra.mrb[0].mxu0 %v1638_v26 }
  0xa0   :  { %v166_v63 = vpop.permute.xlu0 %165 }
  0xe6   :  { %v881_v54 = vpop.f32.mrb[0].mxu1 }
  0xe7   :  { %v883_v55 = vpop.f32.mrb[1].mxu1 }
  0xe8   :  { %v885_v56 = vpop.f32.mrb[2].mxu1 }
  0xe9   :  { %v886_v57 = vpop.f32.mrb[3].mxu1 }
 0x106   :  { %v1150_v58 = vpop.f32.mrb[4].mxu1 }
 0x107   :  { %v1151_v59 = vpop.f32.mrb[5].mxu1 }
 0x108   :  { %v1152_v60 = vadd.f32 %v1151_v59, %v1150_v58  ;;  %v1153_v61 = vpop.f32.mrb[6].mxu1 }
 0x109   :  { %v1154_v62 = vpop.f32.mrb[7].mxu1 }
 0x10a   :  { %v923_v1 = vadd.f32 %v1152_v60, %v166_v63 }
 0x126   :  { %v1172_v0 = vpop.f32.mrb[8].mxu1 }
 0x127   :  { %v1173_v2 = vpop.f32.mrb[9].mxu1 }
 0x128   :  { %v1174_v3 = vadd.f32 %v1173_v2, %v1172_v0  ;;  %v1175_v4 = vpop.f32.mrb[10].mxu1 }
 0x129   :  { %v1176_v5 = vpop.f32.mrb[11].mxu1 }
 0x12a   :  { %v963_v6 = vadd.f32 %v1174_v3, %v923_v1 }
 0x136   :  { %v1002_v7 = vpop.f32.mrb[12].mxu1 }
 0x137   :  { %v1003_v8 = vadd.f32 %v1002_v7, %v963_v6  ;;  %v1193_v9 = vpop.f32.mrb[13].mxu1 }
 0x138   :  { %v1005_v10 = vpop.f32.mrb[14].mxu1 }
 0x139   :  { %v1010_v11 = vmax.f32 %v1003_v8, 0.0  ;;  %v1194_v12 = vpop.f32.mrb[15].mxu1 }
 0x13b   :  { %1014 = vst.msk [vmem:[%s1737_s3 + $0x10] sm:$0xff] %vm1013_vm2, %v1010_v11 }
 0x155   :  { %v840_v13 = vpop.f32.mrb[0].mxu0 }
 0x156   :  { %v1195_v14 = vadd.f32 %v840_v13, %v166_v63  ;;  %v842_v15 = vpop.f32.mrb[1].mxu0 }
 0x157   :  { %v1197_v16 = vadd.f32 %v842_v15, %v166_v63  ;;  %v844_v17 = vpop.f32.mrb[2].mxu0 }
 0x158   :  { %v1196_v18 = vadd.f32 %v1195_v14, %v881_v54  ;;  %v845_v19 = vpop.f32.mrb[3].mxu0 }
 0x159   :  { %v1198_v21 = vadd.f32 %v1197_v16, %v883_v55 }
 0x15a   :  { %v1008_v22 = vmax.f32 %v1196_v18, 0.0 }
 0x15b   :  { %v1009_v23 = vmax.f32 %v1198_v21, 0.0 }
 0x15c   :  { %1011 = vst [vmem:[%s1737_s3] sm:$0xff] %v1008_v22 }
 0x15d   :  { %1012 = vst [vmem:[%s1737_s3 + $0x8] sm:$0xff] %v1009_v23 }

// kernel: autoencoder_forward.9
= control target key start
LH: loop header
LB: loop body
LE: loop exit
PB: predicated region body
PF: predicated region fallthrough
CT: control target
= control target key end

     0   :  { %v435_v1 = vmov 0   ;;  %v56_v36 = vlaneseq  ;;  %v436_v53 = vmov 1966171168   ;;  %s562_s0 = inlined_call_operand.vmem [shape: bf16[128,450], index: 0, kind: input, shape index: {}]   ;;  %s563_s2 = inlined_call_operand.<no memory space> [shape: f32[1,1], index: 2, kind: input, shape index: {}]   ;;  %s564_s1 = inlined_call_operand.vmem [shape: bf16[1,128], index: 1, kind: input, shape index: {}]   ;;  %s565_s3 = inlined_call_operand.vmem [shape: f32[1,450], index: 3, kind: output, shape index: {}]  }
   0x1   :  { %v379_v0 = vld [vmem:[%s562_s0 + $0x4] ss:$16 sps:$4 sm:$0xff]   ;;  %252 = vmatprep.mubr.bf16.mxu0 %v435_v1  ;;  %293 = vmatprep.mubr.bf16.mxu1 %v435_v1  ;;  %v8_v2 = vstv %s563_s2  ;;  %v381_v3 = vld [vmem:[%s562_s0 + $0xc] ss:$16 sps:$4 sm:$0xff]   ;;  %v383_v4 = vld [vmem:[%s562_s0] ss:$16 sps:$4 sm:$0xff]   ;;  %v313_v54 = vunpack.c.l.s4 %v436_v53 }
   0x2   :  { %378 = vset.pattern.permute.xlu0 %v435_v1  ;;  %9 = vst [vmem:[#allocation2] sm:$0x1] %v8_v2  ;;  %220 = vmatprep.subr.bf16.mxu0 %v379_v0  ;;  %v384_v5 = vld [vmem:[%s562_s0 + $0x8] ss:$16 sps:$4 sm:$0xff]   ;;  %v385_v6 = vld [vmem:[%s562_s0 + $0x24] ss:$16 sps:$4 sm:$0xff]  }
   0x3   :  { %261 = vmatprep.subr.bf16.mxu1 %v381_v3  ;;  %221 = vmatpush1.bf16.msra.mxu0 %v383_v4  ;;  %v387_v7 = vld [vmem:[%s562_s0 + $0x2c] ss:$16 sps:$4 sm:$0xff]   ;;  %v389_v8 = vld [vmem:[%s562_s0 + $0x20] ss:$16 sps:$4 sm:$0xff]   ;;  %v390_v9 = vld [vmem:[%s562_s0 + $0x28] ss:$16 sps:$4 sm:$0xff]   ;;  %v314_v55 = vunpack.c.0.s8 %v313_v54 }
   0x4   :  { %262 = vmatpush1.bf16.msra.mxu1 %v384_v5  ;;  %222 = vmatprep.subr.bf16.mxu0 %v385_v6  ;;  %v391_v10 = vld [vmem:[%s562_s0 + $0x44] ss:$16 sps:$4 sm:$0xff]   ;;  %v393_v11 = vld [vmem:[%s562_s0 + $0x4c] ss:$16 sps:$4 sm:$0xff]   ;;  %v395_v12 = vld [vmem:[%s562_s0 + $0x40] ss:$16 sps:$4 sm:$0xff]  }
   0x5   :  { %263 = vmatprep.subr.bf16.mxu1 %v387_v7  ;;  %v396_v13 = vld [vmem:[%s562_s0 + $0x48] ss:$16 sps:$4 sm:$0xff]   ;;  %v397_v14 = vld [vmem:[%s562_s0 + $0x64] ss:$16 sps:$4 sm:$0xff]   ;;  %v399_v15 = vld [vmem:[%s562_s0 + $0x6c] ss:$16 sps:$4 sm:$0xff]  }
   0x6   :  { %v401_v16 = vld [vmem:[%s562_s0 + $0x60] ss:$16 sps:$4 sm:$0xff]   ;;  %v402_v17 = vld [vmem:[%s562_s0 + $0x68] ss:$16 sps:$4 sm:$0xff]   ;;  %v403_v18 = vld [vmem:[%s562_s0 + $0x84] ss:$16 sps:$4 sm:$0xff]  }
   0x7   :  { %223 = vmatpush1.bf16.msra.mxu0 %v389_v8  ;;  %v405_v19 = vld [vmem:[%s562_s0 + $0x8c] ss:$16 sps:$4 sm:$0xff]   ;;  %v407_v20 = vld [vmem:[%s562_s0 + $0x80] ss:$16 sps:$4 sm:$0xff]   ;;  %v408_v21 = vld [vmem:[%s562_s0 + $0x88] ss:$16 sps:$4 sm:$0xff]  }
   0x8   :  { %264 = vmatpush1.bf16.msra.mxu1 %v390_v9  ;;  %224 = vmatprep.subr.bf16.mxu0 %v391_v10  ;;  %v409_v22 = vld [vmem:[%s562_s0 + $0xa4] ss:$16 sps:$4 sm:$0xff]   ;;  %v411_v23 = vld [vmem:[%s562_s0 + $0xac] ss:$16 sps:$4 sm:$0xff]   ;;  %v413_v24 = vld [vmem:[%s562_s0 + $0xa0] ss:$16 sps:$4 sm:$0xff]  }
   0x9   :  { %265 = vmatprep.subr.bf16.mxu1 %v393_v11  ;;  %v414_v25 = vld [vmem:[%s562_s0 + $0xa8] ss:$16 sps:$4 sm:$0xff]   ;;  %v415_v26 = vld [vmem:[%s562_s0 + $0xc4] ss:$16 sps:$4 sm:$0xff]   ;;  %v417_v27 = vld [vmem:[%s562_s0 + $0xcc] ss:$16 sps:$4 sm:$0xff]  }
   0xa   :  { %v50_v28 = vld [vmem:[#allocation2] sm:$0x1]  ;;  %v420_v30 = vld [vmem:[%s562_s0 + $0xc8] ss:$16 sps:$4 sm:$0xff]   ;;  %v421_v31 = vld [vmem:[%s562_s0 + $0xe4] ss:$16 sps:$4 sm:$0xff]  }
   0xb   :  { %225 = vmatpush1.bf16.msra.mxu0 %v395_v12  ;;  %53 = vperm.xlu0 %378, %v50_v28   ;;  %v419_v29 = vld [vmem:[%s562_s0 + $0xc0] ss:$16 sps:$4 sm:$0xff]   ;;  %v423_v32 = vld [vmem:[%s562_s0 + $0xec] ss:$16 sps:$4 sm:$0xff]   ;;  %v426_v34 = vld [vmem:[%s562_s0 + $0xe8] ss:$16 sps:$4 sm:$0xff]  }
   0xc   :  { %266 = vmatpush1.bf16.msra.mxu1 %v396_v13  ;;  %226 = vmatprep.subr.bf16.mxu0 %v397_v14  ;;  %v425_v33 = vld [vmem:[%s562_s0 + $0xe0] ss:$16 sps:$4 sm:$0xff]   ;;  %v57_v37 = vshrl.u32 %v56_v36, 7  ;;  %vm337_vm0 = vcmp.lt.s32.totalorder %v56_v36, 450 }
   0xd   :  { %267 = vmatprep.subr.bf16.mxu1 %v399_v15  ;;  %v17_v35 = vld [vmem:[%s564_s1] sm:$0x1] }
   0xe   :  { %v58_v38 = vsub.s32 0, %v57_v37  ;;  %v317_v58 = vsub.s32 %v314_v55, %v57_v37 }
   0xf   :  { %227 = vmatpush1.bf16.msra.mxu0 %v401_v16 }
  0x10   :  { %268 = vmatpush1.bf16.msra.mxu1 %v402_v17  ;;  %228 = vmatprep.subr.bf16.mxu0 %v403_v18 }
  0x11   :  { %269 = vmatprep.subr.bf16.mxu1 %v405_v19 }
  0x13   :  { %229 = vmatpush1.bf16.msra.mxu0 %v407_v20 }
  0x14   :  { %270 = vmatpush1.bf16.msra.mxu1 %v408_v21  ;;  %230 = vmatprep.subr.bf16.mxu0 %v409_v22 }
  0x15   :  { %271 = vmatprep.subr.bf16.mxu1 %v411_v23 }
  0x17   :  { %231 = vmatpush1.bf16.msra.mxu0 %v413_v24 }
  0x18   :  { %272 = vmatpush1.bf16.msra.mxu1 %v414_v25  ;;  %232 = vmatprep.subr.bf16.mxu0 %v415_v26 }
  0x19   :  { %273 = vmatprep.subr.bf16.mxu1 %v417_v27 }
  0x1b   :  { %233 = vmatpush1.bf16.msra.mxu0 %v419_v29 }
  0x1c   :  { %274 = vmatpush1.bf16.msra.mxu1 %v420_v30  ;;  %234 = vmatprep.subr.bf16.mxu0 %v421_v31 }
  0x1d   :  { %275 = vmatprep.subr.bf16.mxu1 %v423_v32 }
  0x1f   :  { %235 = vmatpush1.bf16.msra.mxu0 %v425_v33 }
  0x20   :  { %276 = vmatpush1.bf16.msra.mxu1 %v426_v34 }
  0x22   :  { %253 = vmatmul.mubr.bf16.vlgmr.msra.gmra.mrb[0].mxu0 %v17_v35 }
  0x23   :  { %294 = vmatmul.mubr.bf16.vlgmr.msra.gmra.mrb[0].mxu1 %v17_v35 }
  0x8a   :  { %v54_v39 = vpop.permute.xlu0 %53 }
  0x8b   :  { %v59_v40 = vrot.slane %v54_v39, %v58_v38 }
  0xf5   :  { %v254_v41 = vpop.f32.mrb[0].mxu0 }
  0xf6   :  { %v295_v42 = vpop.f32.mrb[0].mxu1  ;;  %v255_v43 = vadd.f32 %v254_v41, %v59_v40  ;;  %v256_v45 = vpop.f32.mrb[1].mxu0 }
  0xf7   :  { %v296_v44 = vadd.f32 %v295_v42, %v59_v40  ;;  %v297_v46 = vpop.f32.mrb[1].mxu1  ;;  %v257_v47 = vadd.f32 %v256_v45, %v59_v40  ;;  %v258_v49 = vpop.f32.mrb[2].mxu0 }
  0xf8   :  { %v298_v48 = vadd.f32 %v297_v46, %v59_v40  ;;  %v299_v50 = vpop.f32.mrb[2].mxu1  ;;  %427 = vtanh.f32 %v255_v43  ;;  %v259_v51 = vpop.f32.mrb[3].mxu0 }
  0xf9   :  { %v300_v52 = vpop.f32.mrb[3].mxu1  ;;  %429 = vtanh.f32 %v296_v44 }
  0xfa   :  { %431 = vtanh.f32 %v257_v47 }
  0xfb   :  { %433 = vtanh.f32 %v298_v48 }
 0x102   :  { %v428_v56 = vpop.eup %427 }
 0x103   :  { %v430_v57 = vpop.eup %429 }
 0x104   :  { %v432_v59 = vpop.eup %431 }
 0x105   :  { %v434_v60 = vpop.eup %433  ;;  %v310_v61 = vcombine.low %v428_v56, %v432_v59 }
 0x106   :  { %v311_v62 = vcombine.low %v430_v57, %v434_v60 }
 0x107   :  { %v318_v63 = vrot.slane %v310_v61, %v317_v58 }
 0x108   :  { %v325_v0 = vrot.slane %v311_v62, %v317_v58 }
 0x10a   :  { %v326_v1 = vcombine.low %v318_v63, %v325_v0 }
 0x10c   :  { %v333_v2 = vrot.slane %v326_v1, %v317_v58 }
 0x10e   :  { %339 = vst.msk [vmem:[%s565_s3] sm:$0xf] %vm337_vm0, %v333_v2 }

</bundles_post_ra>
